<compile_context>
chip_gen: v7x
topology: tpu7x:2x2x1
jax: 0.10.0
libtpu: 0.0.40
codegen_flags: <defaults>
</compile_context>

<pallas_src>
import functools
import jax
import jax.numpy as jnp
from jax.experimental import pallas as pl
from jax.experimental.pallas import tpu as pltpu

BN_EPS = 1e-5


# ---------------------------------------------------------------------------
# Pallas kernels
# ---------------------------------------------------------------------------
def matmul_stats_kernel(a_ref, b_ref, o_ref, sum_ref, ssq_ref, acc_ref, *,
                        tm, valid_m, ragged):
    """bf16 MXU GEMM with f32 accumulator. On the last K step: store the bf16 output
    tile and per-channel partial sum / sum-of-squares (BN stats fused into the epilogue)."""
    @pl.when(pl.program_id(2) == 0)
    def _():
        acc_ref[...] = jnp.zeros_like(acc_ref)

    acc_ref[...] += jnp.dot(a_ref[...], b_ref[...],
                            preferred_element_type=jnp.float32)

    @pl.when(pl.program_id(2) == pl.num_programs(2) - 1)
    def _():
        acc = acc_ref[...]
        o_ref[...] = acc.astype(o_ref.dtype)
        if ragged:
            # mask rows past M in the last (ragged) M tile so stats stay exact
            row = (jax.lax.broadcasted_iota(jnp.int32, acc.shape, 0)
                   + pl.program_id(0) * tm)
            acc = jnp.where(row < valid_m, acc, 0.0)
        s = jnp.sum(acc, axis=0, keepdims=True)          # (1, tn)
        q = jnp.sum(acc * acc, axis=0, keepdims=True)    # (1, tn)
        # stats blocks are (1, 8, tn); row 0 carries the data (8-row broadcast keeps
        # the sublane dim a multiple of 8)
        sum_ref[...] = jnp.broadcast_to(s[None], sum_ref.shape)
        ssq_ref[...] = jnp.broadcast_to(q[None], ssq_ref.shape)


def bn_apply_kernel(x_ref, scale_ref, shift_ref, o_ref, *, relu):
    """y = x*scale + shift (+ReLU); bf16 in/out, f32 math."""
    y = x_ref[...].astype(jnp.float32) * scale_ref[...] + shift_ref[...]
    if relu:
        y = jnp.maximum(y, 0.0)
    o_ref[...] = y.astype(o_ref.dtype)


def bn_apply_add_relu_kernel(x_ref, res_ref, scale_ref, shift_ref, o_ref):
    """y = relu(x*scale + shift + residual); bf16 in/out, f32 math (BasicBlock tail)."""
    y = (x_ref[...].astype(jnp.float32) * scale_ref[...] + shift_ref[...]
         + res_ref[...].astype(jnp.float32))
    o_ref[...] = jnp.maximum(y, 0.0).astype(o_ref.dtype)


def maxpool_kernel(*refs):
    """Elementwise max over the k*k shifted views (tiled over rows)."""
    o_ref = refs[-1]
    acc = refs[0][...]
    for r in refs[1:-1]:
        acc = jnp.maximum(acc, r[...])
    o_ref[...] = acc


def mean_axis1_kernel(x_ref, o_ref):
    """(1, S, D) -> (1, 1, D) mean over axis 1, accumulated in f32."""
    o_ref[...] = jnp.mean(x_ref[...].astype(jnp.float32), axis=1, keepdims=True)


# ---------------------------------------------------------------------------
# GEMM wrapper (with fused BN stats)
# ---------------------------------------------------------------------------
def _pick_tm(M):
    """Prefer a divisor of M giving >=2 i-tiles (megacore / no ragged waste)."""
    for cand in (512, 256, 128, 64, 32, 16, 8):
        if M % cand == 0 and M // cand >= 2:
            return cand
    return min(M, 256)


def _pick_tn(N):
    if N <= 128:
        return N
    if N % 256 == 0:
        return 256
    if N % 128 == 0:
        return 128
    return N


def _pick_tk(K):
    """Full K when small (single K step), else the largest exact divisor."""
    if K <= 1200:
        return K
    for cand in (1152, 1024, 768, 576, 512, 384, 256, 128):
        if K % cand == 0:
            return cand
    return K


def matmul_stats(a, b):
    """a (M,K) @ b (K,N) -> (out bf16 (M,N), per-col sum (N,) f32, per-col sumsq (N,) f32)."""
    M, K = a.shape
    K2, N = b.shape
    assert K == K2
    a = a.astype(jnp.bfloat16)
    b = b.astype(jnp.bfloat16)

    tm, tn, tk = _pick_tm(M), _pick_tn(N), _pick_tk(K)
    nmi = pl.cdiv(M, tm)
    grid = (nmi, pl.cdiv(N, tn), pl.cdiv(K, tk))
    ragged = (M % tm) != 0

    out, psum, pssq = pl.pallas_call(
        functools.partial(matmul_stats_kernel, tm=tm, valid_m=M, ragged=ragged),
        out_shape=(jax.ShapeDtypeStruct((M, N), jnp.bfloat16),
                   jax.ShapeDtypeStruct((nmi, 8, N), jnp.float32),
                   jax.ShapeDtypeStruct((nmi, 8, N), jnp.float32)),
        grid_spec=pltpu.PrefetchScalarGridSpec(
            num_scalar_prefetch=0,
            grid=grid,
            in_specs=[pl.BlockSpec((tm, tk), lambda i, j, k: (i, k)),
                      pl.BlockSpec((tk, tn), lambda i, j, k: (k, j))],
            out_specs=[pl.BlockSpec((tm, tn), lambda i, j, k: (i, j)),
                       pl.BlockSpec((1, 8, tn), lambda i, j, k: (i, 0, j)),
                       pl.BlockSpec((1, 8, tn), lambda i, j, k: (i, 0, j))],
            scratch_shapes=[pltpu.VMEM((tm, tn), jnp.float32)]),
        compiler_params=pltpu.CompilerParams(
            dimension_semantics=("parallel", "parallel", "arbitrary")),
    )(a, b)

    col_sum = psum[:, 0, :].sum(axis=0)   # fold per-i-tile partials (tiny glue)
    col_ssq = pssq[:, 0, :].sum(axis=0)
    return out, col_sum, col_ssq


def conv2d_stats(x, w, stride, padding):
    """x (N,H,W,Cin), w (kh,kw,Cin,Cout) -> (y bf16 (N,Ho,Wo,Cout), ch_sum, ch_sumsq).
    bf16 im2col is plain-JAX glue; the fused-stats GEMM is the Pallas hot path."""
    N, H, W, Cin = x.shape
    kh, kw, _, Cout = w.shape
    xb = x.astype(jnp.bfloat16)
    if padding:
        xb = jnp.pad(xb, ((0, 0), (padding, padding), (padding, padding), (0, 0)))
    Ho = (H + 2 * padding - kh) // stride + 1
    Wo = (W + 2 * padding - kw) // stride + 1

    if kh == 1 and kw == 1:
        xs = xb[:, ::stride, ::stride, :] if stride > 1 else xb
        A = xs.reshape(N * Ho * Wo, Cin)
    else:
        # TODO(synk): implicit-GEMM (shifted-window reads inside the kernel) would
        # remove this kh*kw-times-materialized bf16 copy.
        patches = []
        for dy in range(kh):
            for dx in range(kw):
                patches.append(jax.lax.slice(
                    xb,
                    (0, dy, dx, 0),
                    (N, dy + (Ho - 1) * stride + 1, dx + (Wo - 1) * stride + 1, Cin),
                    (1, stride, stride, 1)))
        patches = jnp.stack(patches, axis=3)              # (N, Ho, Wo, kh*kw, Cin)
        A = patches.reshape(N * Ho * Wo, kh * kw * Cin)

    B = w.astype(jnp.bfloat16).reshape(kh * kw * Cin, Cout)
    out, s, ss = matmul_stats(A, B)
    return out.reshape(N, Ho, Wo, Cout), s, ss


# ---------------------------------------------------------------------------
# BatchNorm apply (stats come fused from the GEMM), maxpool, global pool
# ---------------------------------------------------------------------------
def _pack_factor(M, C):
    """Lane-pack factor r so the last dim becomes r*C (128-wide) when C < 128."""
    if C < 128 and 128 % C == 0 and M % (128 // C) == 0:
        return 128 // C
    return 1


def _bn_scale_shift(col_sum, col_ssq, count, gamma, beta):
    # NOTE: E[x^2]-E[x]^2 in f32; clamped at 0 (cancellation guard).
    mean = col_sum / count
    var = jnp.maximum(col_ssq / count - mean * mean, 0.0)
    scale = gamma * jax.lax.rsqrt(var + BN_EPS)
    shift = beta - mean * scale
    return scale, shift


def _bn_apply(x2, res2, scale, shift, relu):
    """y = x*scale + shift [+ res] [+ReLU], tiled over rows, lane-packed, bf16 out."""
    M, C = x2.shape
    r = _pack_factor(M, C)
    Mp, Cp = M // r, C * r
    xp = x2.reshape(Mp, Cp)
    scale_p = jnp.tile(scale.reshape(1, C), (1, r)).astype(jnp.float32)
    shift_p = jnp.tile(shift.reshape(1, C), (1, r)).astype(jnp.float32)
    bm = min(Mp, 1024)
    grid = (pl.cdiv(Mp, bm),)

    if res2 is None:
        kern = functools.partial(bn_apply_kernel, relu=relu)
        args = (xp, scale_p, shift_p)
        in_specs = [pl.BlockSpec((bm, Cp), lambda i: (i, 0)),
                    pl.BlockSpec((1, Cp), lambda i: (0, 0)),
                    pl.BlockSpec((1, Cp), lambda i: (0, 0))]
    else:
        kern = bn_apply_add_relu_kernel
        args = (xp, res2.reshape(Mp, Cp), scale_p, shift_p)
        in_specs = [pl.BlockSpec((bm, Cp), lambda i: (i, 0)),
                    pl.BlockSpec((bm, Cp), lambda i: (i, 0)),
                    pl.BlockSpec((1, Cp), lambda i: (0, 0)),
                    pl.BlockSpec((1, Cp), lambda i: (0, 0))]

    out = pl.pallas_call(
        kern,
        out_shape=jax.ShapeDtypeStruct((Mp, Cp), jnp.bfloat16),
        grid_spec=pltpu.PrefetchScalarGridSpec(
            num_scalar_prefetch=0, grid=grid,
            in_specs=in_specs,
            out_specs=pl.BlockSpec((bm, Cp), lambda i: (i, 0))),
        compiler_params=pltpu.CompilerParams(dimension_semantics=("parallel",)),
    )(*args)
    return out.reshape(M, C)


def batchnorm_conv(conv_out, col_sum, col_ssq, gamma, beta, relu, residual=None):
    """Training-mode BatchNorm2d over the conv output using the fused GEMM stats,
    optionally fused with residual add + ReLU."""
    N, H, W, C = conv_out.shape
    M = N * H * W
    scale, shift = _bn_scale_shift(col_sum, col_ssq, M, gamma, beta)
    x2 = conv_out.reshape(M, C)
    r2 = None if residual is None else residual.reshape(M, C)
    y2 = _bn_apply(x2, r2, scale, shift, relu)
    return y2.reshape(N, H, W, C)


def maxpool2d(x, k=3, stride=2, padding=1):
    """MaxPool2d(3, 2, 1); -inf padding like PyTorch. bf16 data, tiled over rows."""
    N, H, W, C = x.shape
    xp = jnp.pad(x, ((0, 0), (padding, padding), (padding, padding), (0, 0)),
                 constant_values=-jnp.inf)
    Ho = (H + 2 * padding - k) // stride + 1
    Wo = (W + 2 * padding - k) // stride + 1
    M = N * Ho * Wo

    slices = []
    for dy in range(k):
        for dx in range(k):
            slices.append(jax.lax.slice(
                xp,
                (0, dy, dx, 0),
                (N, dy + (Ho - 1) * stride + 1, dx + (Wo - 1) * stride + 1, C),
                (1, stride, stride, 1)).reshape(M, C))

    r = _pack_factor(M, C)                    # lane-dense stores for C=64
    Mp, Cp = M // r, C * r
    slices = [s.reshape(Mp, Cp) for s in slices]
    bm = min(Mp, 1024)
    grid = (pl.cdiv(Mp, bm),)

    out = pl.pallas_call(
        maxpool_kernel,
        out_shape=jax.ShapeDtypeStruct((Mp, Cp), x.dtype),
        grid_spec=pltpu.PrefetchScalarGridSpec(
            num_scalar_prefetch=0, grid=grid,
            in_specs=[pl.BlockSpec((bm, Cp), lambda i: (i, 0))] * (k * k),
            out_specs=pl.BlockSpec((bm, Cp), lambda i: (i, 0))),
        compiler_params=pltpu.CompilerParams(dimension_semantics=("parallel",)),
    )(*slices)
    return out.reshape(N, Ho, Wo, C)


def mean_axis1(x):
    """(B, S, D) -> (B, D) f32 mean over axis 1, gridded over B."""
    B, S, D = x.shape
    out = pl.pallas_call(
        mean_axis1_kernel,
        out_shape=jax.ShapeDtypeStruct((B, 1, D), jnp.float32),
        grid_spec=pltpu.PrefetchScalarGridSpec(
            num_scalar_prefetch=0, grid=(B,),
            in_specs=[pl.BlockSpec((1, S, D), lambda b: (b, 0, 0))],
            out_specs=pl.BlockSpec((1, 1, D), lambda b: (b, 0, 0))),
        compiler_params=pltpu.CompilerParams(dimension_semantics=("parallel",)),
    )(x)
    return out.reshape(B, D)


def global_avg_pool(x):
    """AdaptiveAvgPool2d(1) + flatten: (N, H, W, C) -> (N, C) f32."""
    N, H, W, C = x.shape
    return mean_axis1(x.reshape(N, H * W, C))


# ---------------------------------------------------------------------------
# ResNet-18 (BasicBlock, layers=[2,2,2,2]) parameters & forward
# ---------------------------------------------------------------------------
def make_resnet18_params(key):
    keys = iter(jax.random.split(key, 64))

    def conv_w(cin, cout, k):
        # kaiming_normal_(mode='fan_out', nonlinearity='relu'): std = sqrt(2 / (cout*k*k))
        std = (2.0 / (cout * k * k)) ** 0.5
        return jax.random.normal(next(keys), (k, k, cin, cout), jnp.float32) * std

    params = {
        'conv1_w': conv_w(3, 64, 7),
        'bn1_g': jnp.ones((64,), jnp.float32),
        'bn1_b': jnp.zeros((64,), jnp.float32),
        'layers': [],
    }
    inplanes = 64
    for planes, nblocks, stride in [(64, 2, 1), (128, 2, 2), (256, 2, 2), (512, 2, 2)]:
        blocks = []
        for bi in range(nblocks):
            s = stride if bi == 0 else 1
            blk = {
                'stride': s,
                'conv1_w': conv_w(inplanes, planes, 3),
                'bn1_g': jnp.ones((planes,), jnp.float32),
                'bn1_b': jnp.zeros((planes,), jnp.float32),
                'conv2_w': conv_w(planes, planes, 3),
                'bn2_g': jnp.ones((planes,), jnp.float32),
                'bn2_b': jnp.zeros((planes,), jnp.float32),
            }
            if s != 1 or inplanes != planes:
                blk['down_w'] = conv_w(inplanes, planes, 1)
                blk['dbn_g'] = jnp.ones((planes,), jnp.float32)
                blk['dbn_b'] = jnp.zeros((planes,), jnp.float32)
            blocks.append(blk)
            inplanes = planes
        params['layers'].append(blocks)
    return params


def basic_block(x, p):
    s = p['stride']
    out, s1, q1 = conv2d_stats(x, p['conv1_w'], stride=s, padding=1)
    out = batchnorm_conv(out, s1, q1, p['bn1_g'], p['bn1_b'], relu=True)
    out, s2, q2 = conv2d_stats(out, p['conv2_w'], stride=1, padding=1)
    if 'down_w' in p:
        idn, sd, qd = conv2d_stats(x, p['down_w'], stride=s, padding=0)
        identity = batchnorm_conv(idn, sd, qd, p['dbn_g'], p['dbn_b'], relu=False)
    else:
        identity = x
    return batchnorm_conv(out, s2, q2, p['bn2_g'], p['bn2_b'], relu=True,
                          residual=identity)


def resnet18_forward(params, x):
    """x: NCHW (B, 3, H, W) or NCDHW (B, 3, D, H, W), like the PyTorch module."""
    threedim = (x.ndim == 5)
    batch_size = x.shape[0]
    if threedim:
        # x.transpose(1, 2).reshape(-1, C, H, W)
        x = jnp.transpose(x, (0, 2, 1, 3, 4)).reshape(-1, x.shape[1], x.shape[3], x.shape[4])
    x = jnp.transpose(x, (0, 2, 3, 1)).astype(jnp.float32)  # NCHW -> NHWC

    x, s0, q0 = conv2d_stats(x, params['conv1_w'], stride=2, padding=3)
    x = batchnorm_conv(x, s0, q0, params['bn1_g'], params['bn1_b'], relu=True)
    x = maxpool2d(x, k=3, stride=2, padding=1)

    for blocks in params['layers']:   # layer1..layer4 (resnet18 uses layer4)
        for blk in blocks:
            x = basic_block(x, blk)

    feat = global_avg_pool(x)         # (N, 512) f32, equivalent to avgpool + view
    if threedim:
        feat = feat.reshape(batch_size, -1, feat.shape[1])
        feat = mean_axis1(feat)       # mean over slices
    return feat
    # TODO(synk): load_weights() (timm / torch.load checkpoint loading) has no Pallas equivalent.


# ---------------------------------------------------------------------------
if __name__ == "__main__":
    key = jax.random.PRNGKey(0)
    pkey, xkey = jax.random.split(key)
    params = make_resnet18_params(pkey)

    x = jax.random.normal(xkey, (2, 3, 32, 32), jnp.float32)  # small NCHW patch
    feat = resnet18_forward(params, x)
    feat = jax.block_until_ready(feat)

    assert feat.shape == (2, 512), feat.shape          # get_output_dim() == 512
    assert bool(jnp.all(jnp.isfinite(feat)))
    print("KERNEL_OK")
</pallas_src>

<mosaic_0001>
module attributes {stable_mosaic.version = 11 : i64} {
  func.func @matmul_stats_kernel(%arg0: i32, %arg1: i32, %arg2: i32, %arg3: memref<256x147xbf16, #tpu.memory_space<vmem>>, %arg4: memref<147x64xbf16, #tpu.memory_space<vmem>>, %arg5: memref<256x64xbf16, #tpu.memory_space<vmem>>, %arg6: memref<1x8x64xf32, #tpu.memory_space<vmem>>, %arg7: memref<1x8x64xf32, #tpu.memory_space<vmem>>, %arg8: memref<256x64xf32, #tpu.memory_space<vmem>>) attributes {dimension_semantics = [#tpu.dimension_semantics<parallel>, #tpu.dimension_semantics<parallel>, #tpu.dimension_semantics<arbitrary>], iteration_bounds = array<i64: 2, 1, 1>, scalar_prefetch = 0 : i64, scratch_operands = 1 : i64, tpu.core_type = #tpu.core_type<tc>, window_params = [{transform_indices = @transform_0, window_bounds = array<i64: 256, 147>}, {transform_indices = @transform_1, window_bounds = array<i64: 147, 64>}, {transform_indices = @transform_2, window_bounds = array<i64: 256, 64>}, {transform_indices = @transform_3, window_bounds = array<i64: 1, 8, 64>}, {transform_indices = @transform_4, window_bounds = array<i64: 1, 8, 64>}]} {
    %c0_i32 = arith.constant 0 : i32
    %0 = arith.cmpi eq, %arg2, %c0_i32 : i32
    %1 = arith.extui %0 : i1 to i32
    %c0_i32_0 = arith.constant 0 : i32
    %2 = arith.cmpi ne, %1, %c0_i32_0 : i32
    scf.if %2 {
      %cst_10 = arith.constant 0.000000e+00 : f32
      %12 = vector.broadcast %cst_10 : f32 to vector<256x64xf32>
      %c0_11 = arith.constant 0 : index
      %c0_12 = arith.constant 0 : index
      %13 = vector.load %arg8[%c0_11, %c0_12] : memref<256x64xf32, #tpu.memory_space<vmem>>, vector<256x64xf32>
      tpu.vector_store %arg8[%c0_11, %c0_12], %12 {strides = array<i32>} : memref<256x64xf32, #tpu.memory_space<vmem>>, vector<256x64xf32>,
    } else {
    }
    %c0 = arith.constant 0 : index
    %c0_1 = arith.constant 0 : index
    %3 = vector.load %arg8[%c0, %c0_1] : memref<256x64xf32, #tpu.memory_space<vmem>>, vector<256x64xf32>
    %c0_2 = arith.constant 0 : index
    %c0_3 = arith.constant 0 : index
    %4 = vector.load %arg3[%c0_2, %c0_3] : memref<256x147xbf16, #tpu.memory_space<vmem>>, vector<256x147xbf16>
    %c0_4 = arith.constant 0 : index
    %c0_5 = arith.constant 0 : index
    %5 = vector.load %arg4[%c0_4, %c0_5] : memref<147x64xbf16, #tpu.memory_space<vmem>>, vector<147x64xbf16>
    %cst = arith.constant dense<0.000000e+00> : vector<256x64xf32>
    %6 = tpu.matmul %4, %5, %cst {dimension_numbers = #tpu.dot_dimension_numbers<[1], [0], [0], [1], [0, 0, 1, 1], [], []>} : vector<256x147xbf16>, vector<147x64xbf16>, vector<256x64xf32> -> vector<256x64xf32>
    %7 = arith.addf %3, %6 : vector<256x64xf32>
    %c0_6 = arith.constant 0 : index
    %c0_7 = arith.constant 0 : index
    %8 = vector.load %arg8[%c0_6, %c0_7] : memref<256x64xf32, #tpu.memory_space<vmem>>, vector<256x64xf32>
    tpu.vector_store %arg8[%c0_6, %c0_7], %7 {strides = array<i32>} : memref<256x64xf32, #tpu.memory_space<vmem>>, vector<256x64xf32>,
    %c0_i32_8 = arith.constant 0 : i32
    %9 = arith.cmpi eq, %arg2, %c0_i32_8 : i32
    %10 = arith.extui %9 : i1 to i32
    %c0_i32_9 = arith.constant 0 : i32
    %11 = arith.cmpi ne, %10, %c0_i32_9 : i32
    scf.if %11 {
      %c0_10 = arith.constant 0 : index
      %c0_11 = arith.constant 0 : index
      %12 = vector.load %arg8[%c0_10, %c0_11] : memref<256x64xf32, #tpu.memory_space<vmem>>, vector<256x64xf32>
      %13 = arith.truncf %12 : vector<256x64xf32> to vector<256x64xbf16>
      %c0_12 = arith.constant 0 : index
      %c0_13 = arith.constant 0 : index
      %14 = vector.load %arg5[%c0_12, %c0_13] : memref<256x64xbf16, #tpu.memory_space<vmem>>, vector<256x64xbf16>
      tpu.vector_store %arg5[%c0_12, %c0_13], %13 {strides = array<i32>} : memref<256x64xbf16, #tpu.memory_space<vmem>>, vector<256x64xbf16>,
      %cst_14 = arith.constant dense<0.000000e+00> : vector<64xf32>
      %15 = vector.multi_reduction <add>, %12, %cst_14 [0] : vector<256x64xf32> to vector<64xf32>
      %16 = vector.shape_cast %15 : vector<64xf32> to vector<1x64xf32>
      %17 = arith.mulf %12, %12 : vector<256x64xf32>
      %cst_15 = arith.constant dense<0.000000e+00> : vector<64xf32>
      %18 = vector.multi_reduction <add>, %17, %cst_15 [0] : vector<256x64xf32> to vector<64xf32>
      %19 = vector.shape_cast %18 : vector<64xf32> to vector<1x64xf32>
      %20 = vector.shape_cast %16 : vector<1x64xf32> to vector<1x1x64xf32>
      %21 = vector.shape_cast %20 : vector<1x1x64xf32> to vector<1x1x64xf32>
      %22 = vector.broadcast %21 : vector<1x1x64xf32> to vector<1x8x64xf32>
      %c0_16 = arith.constant 0 : index
      %c0_17 = arith.constant 0 : index
      %c0_18 = arith.constant 0 : index
      %23 = vector.load %arg6[%c0_16, %c0_17, %c0_18] : memref<1x8x64xf32, #tpu.memory_space<vmem>>, vector<1x8x64xf32>
      tpu.vector_store %arg6[%c0_16, %c0_17, %c0_18], %22 {strides = array<i32>} : memref<1x8x64xf32, #tpu.memory_space<vmem>>, vector<1x8x64xf32>,
      %24 = vector.shape_cast %19 : vector<1x64xf32> to vector<1x1x64xf32>
      %25 = vector.shape_cast %24 : vector<1x1x64xf32> to vector<1x1x64xf32>
      %26 = vector.broadcast %25 : vector<1x1x64xf32> to vector<1x8x64xf32>
      %c0_19 = arith.constant 0 : index
      %c0_20 = arith.constant 0 : index
      %c0_21 = arith.constant 0 : index
      %27 = vector.load %arg7[%c0_19, %c0_20, %c0_21] : memref<1x8x64xf32, #tpu.memory_space<vmem>>, vector<1x8x64xf32>
      tpu.vector_store %arg7[%c0_19, %c0_20, %c0_21], %26 {strides = array<i32>} : memref<1x8x64xf32, #tpu.memory_space<vmem>>, vector<1x8x64xf32>,
    } else {
    }
    return
  }
  func.func @transform_0(%arg0: i32, %arg1: i32, %arg2: i32) -> (i32, i32) {
    %c0_i32 = arith.constant 0 : i32
    return %arg0, %arg2 : i32, i32
  }
  func.func @transform_1(%arg0: i32, %arg1: i32, %arg2: i32) -> (i32, i32) {
    %c0_i32 = arith.constant 0 : i32
    return %arg2, %arg1 : i32, i32
  }
  func.func @transform_2(%arg0: i32, %arg1: i32, %arg2: i32) -> (i32, i32) {
    %c0_i32 = arith.constant 0 : i32
    return %arg0, %arg1 : i32, i32
  }
  func.func @transform_3(%arg0: i32, %arg1: i32, %arg2: i32) -> (i32, i32, i32) {
    %c0_i32 = arith.constant 0 : i32
    %c0_i32_0 = arith.constant 0 : i32
    return %arg0, %c0_i32, %arg1 : i32, i32, i32
  }
  func.func @transform_4(%arg0: i32, %arg1: i32, %arg2: i32) -> (i32, i32, i32) {
    %c0_i32 = arith.constant 0 : i32
    %c0_i32_0 = arith.constant 0 : i32
    return %arg0, %c0_i32, %arg1 : i32, i32, i32
  }
}

</mosaic_0001>

<bundles_post_ra>
// kernel: tpu_custom_call.1
= control target key start
LH: loop header
LB: loop body
LE: loop exit
PB: predicated region body
PF: predicated region fallthrough
CT: control target
= control target key end

     0   :  { %10 = vsyncpa [#allocation4], 0  ;;  %s2487_s0 = inlined_call_operand.vmem [shape: bf16[512,147], index: 0, kind: input, shape index: {}]   ;;  %s2488_s1 = inlined_call_operand.vmem [shape: bf16[147,64], index: 1, kind: input, shape index: {}]   ;;  %s2489_s2 = inlined_call_operand.vmem [shape: bf16[512,64], index: 2, kind: output, shape index: {0}]   ;;  %s2490_s3 = inlined_call_operand.hbm [shape: f32[2,8,64], index: 3, kind: output, shape index: {1}]   ;;  %s2491_s4 = inlined_call_operand.hbm [shape: f32[2,8,64], index: 4, kind: output, shape index: {2}]  }
   0x1   :  { %12 = vsyncpa [#allocation4 + $0x1], 0 }
   0x2   :  { %13 = vsyncpa [#allocation6], 0 }
   0x3   :  { %15 = vsyncpa [#allocation6 + $0x1], 0  ;;  %s1908_s15 = smov 0   ;;  %s1910_s16 = smov 0  }
   0x4   :  { %s1912_s17 = smov 0   ;;  %s1914_s18 = smov 0  }
   0x5   :  { %s1916_s19 = smov 0   ;;  %s1918_s20 = smov 0  }
   0x6 LB: > { %s1483_s21 = sadd.s32 4294967295, %s1876_s20   ;;  %s1484_s22 = sadd.s32 4294967294, %s1876_s20   ;;  %s1876_s20 = sphi %s1918_s20, %s21_s20   ;;  %s1872_s19 = sphi %s1916_s19, %s2498_s19   ;;  %s1868_s18 = sphi %s1914_s18, %s2497_s18   ;;  %s1864_s17 = sphi %s1912_s17, %s2496_s17   ;;  %s1860_s16 = sphi %s1910_s16, %s2495_s16   ;;  %s1856_s15 = sphi %s1908_s15, %s2494_s15  }
   0x7   : > { %s40_s23 = sadd.s32 1, %s1872_s19  ;;  %s133_s24 = sadd.s32 1, %s1864_s17 }
   0x8   : > { %p42_p0 = scmp.ge.s32.totalorder %s40_s23, 2  ;;  %p143_p1 = scmp.ne.s32.totalorder %s1864_s17, %s1860_s16 }
   0x9   : > { %p144_p2 = scmp.eq.s32.totalorder %s1483_s21, 1  ;;  %p149_p3 = scmp.ne.s32.totalorder %s1860_s16, %s1856_s15 }
   0xa   : > { %s2500_s23 = smov (%p42_p0, %s40_s23), 0  ;;  %p150_p5 = scmp.eq.s32.totalorder %s1484_s22, 1 }
   0xb   : > { %p1948_p4 = por %p144_p2, %p143_p1  ;;  %s128_s26 = ssub.s32 %s1872_s19, %s2500_s23 }
   0xc   : > { %p1488_p6 = scmp.ge.s32.totalorder %s1876_s20, 1  ;;  %p131_p7 = scmp.eq.s32.totalorder %s128_s26, 0 }
   0xd   : > { %p1955_p8 = por %p150_p5, %p149_p3  ;;  %p223_p9 = scmp.lt.s32.totalorder %s1876_s20, 3 }
   0xe   : > { %s1961_s28 = scalar_select %p131_p7, %s1864_s17, %s133_s24  }
   0xf   : > { %p224_p10 = pnand %p1488_p6, %p223_p9 }
  0x10   : > { %v1708_v0 = vld [vmem:[%s2488_s1] sm:$0xff] (!%p224_p10)   ;;  %v1878_v1 = vmov (!%p224_p10), 0   ;;  %v1709_v2 = vld [vmem:[%s2488_s1 + $0x8] sm:$0xff] (!%p224_p10)   ;;  %v1710_v3 = vld [vmem:[%s2488_s1 + $0x10] sm:$0xff] (!%p224_p10)   ;;  %s1491_s9 = sshll.u32 (!%p224_p10), %s1868_s18, 5  ;;  %vm310_vm0 = vcmask (!%p224_p10), 523264  }
  0x11   : > { %227 = sbr.rel (%p224_p10) target bundleno = 422 (0x1a6), region = 28  ;;  %683 = vmatprep.subr.bf16.mxu0 (!%p224_p10), %v1878_v1  ;;  %1625 = vmatprep.subr.bf16.mxu1 (!%p224_p10), %v1878_v1  ;;  %p277_p11 = scmp.lt.s32.totalorder (!%p224_p10), %s1491_s9, 63  ;;  %v1711_v4 = vld [vmem:[%s2488_s1 + $0x18] sm:$0xff] (!%p224_p10)   ;;  %v1879_v5 = vmov (!%p224_p10), 0.0   ;;  %v1712_v6 = vld [vmem:[%s2488_s1 + $0x20] sm:$0xff] (!%p224_p10)   ;;  %vm627_vm1 = vcmask (!%p224_p10), 154624  }
  0x12   : > { %684 = vmatpush1.bf16.msra.mxu0 (!%p224_p10), %v1708_v0  ;;  %1635 = vmatpush1.bf16.msra.mxu1 (!%p224_p10), %v1708_v0  ;;  %311 = vst.msk [vmem:[#allocation2] sm:$0xff] (!%p224_p10), %vm310_vm0, %v1879_v5  ;;  %312 = vst.msk [vmem:[#allocation2 + $0x8] sm:$0xff] (!%p224_p10), %vm310_vm0, %v1879_v5  ;;  %v1713_v8 = vld [vmem:[%s2488_s1 + $0x28] sm:$0xff] (!%p224_p10)   ;;  %v1714_v10 = vld [vmem:[%s2488_s1 + $0x30] sm:$0xff] (!%p224_p10)   ;;  %vm676_vm2 = vcmask (!%p224_p10), 1040384   ;;  %vm677_vm3 = vcmask (!%p224_p10), 1041408  }
  0x13   : > { %685 = vmatprep.subr.bf16.mxu0 (!%p224_p10), %v1878_v1  ;;  %1626 = vmatprep.subr.bf16.mxu1 (!%p224_p10), %v1878_v1  ;;  %313 = vst.msk [vmem:[#allocation2 + $0x10] sm:$0xff] (!%p224_p10), %vm310_vm0, %v1879_v5  ;;  %314 = vst.msk [vmem:[#allocation2 + $0x18] sm:$0xff] (!%p224_p10), %vm310_vm0, %v1879_v5  ;;  %v1715_v11 = vld [vmem:[%s2488_s1 + $0x38] sm:$0xff] (!%p224_p10)   ;;  %v1880_v12 = vmov (!%p224_p10), 65535   ;;  %v1716_v14 = vld [vmem:[%s2488_s1 + $0x40] sm:$0xff] (!%p224_p10)   ;;  %vm1072_vm4 = vcmask (!%p224_p10), 519168  }
  0x14   : > { %315 = vst.msk [vmem:[#allocation2 + $0x20] sm:$0xff] (!%p224_p10), %vm310_vm0, %v1879_v5  ;;  %316 = vst.msk [vmem:[#allocation2 + $0x28] sm:$0xff] (!%p224_p10), %vm310_vm0, %v1879_v5  ;;  %v678_v13 = vsel (!%p224_p10), %vm676_vm2, 4294967295, %v1880_v12  ;;  %v1717_v15 = vld [vmem:[%s2488_s1 + $0x48] ss:$0 sps:$4 sm:$0x33] (!%p224_p10)  }
  0x15   : > { %317 = vst.msk [vmem:[#allocation2 + $0x30] sm:$0xff] (!%p224_p10), %vm310_vm0, %v1879_v5  ;;  %318 = vst.msk [vmem:[#allocation2 + $0x38] sm:$0xff] (!%p224_p10), %vm310_vm0, %v1879_v5  ;;  %v679_v16 = vsel (!%p224_p10), %vm677_vm3, %v678_v13, 0  ;;  %s1588_s26 = sshll.u32 (!%p224_p10), %s1868_s18, 7 }
  0x16   : > { %686 = vmatpush1.bf16.msra.mxu0 (!%p224_p10), %v1709_v2  ;;  %1636 = vmatpush1.bf16.msra.mxu1 (!%p224_p10), %v1709_v2  ;;  %319 = vst.msk [vmem:[#allocation2 + $0x40] sm:$0xff] (!%p224_p10), %vm310_vm0, %v1879_v5  ;;  %320 = vst.msk [vmem:[#allocation2 + $0x48] sm:$0xff] (!%p224_p10), %vm310_vm0, %v1879_v5  ;;  %v681_v17 = vand.u32 (!%p224_p10), %v1717_v15, %v679_v16  ;;  %s2407_s10 = scalar_lea.hbm (!%p224_p10), %s2490_s3, %s1588_s26 }
  0x17   : > { %687 = vmatprep.subr.bf16.mxu0 (!%p224_p10), %v1878_v1  ;;  %1627 = vmatprep.subr.bf16.mxu1 (!%p224_p10), %v1878_v1  ;;  %321 = vst.msk [vmem:[#allocation2 + $0x50] sm:$0xff] (!%p224_p10), %vm310_vm0, %v1879_v5  ;;  %322 = vst.msk [vmem:[#allocation2 + $0x58] sm:$0xff] (!%p224_p10), %vm310_vm0, %v1879_v5 }
  0x18   : > { %s2502_s9 = smov (!%p277_p11, %s1491_s9), 63  ;;  %323 = vst.msk [vmem:[#allocation2 + $0x60] sm:$0xff] %vm310_vm0, %v1879_v5  ;;  %324 = vst.msk [vmem:[#allocation2 + $0x68] sm:$0xff] %vm310_vm0, %v1879_v5 }
  0x19   : > { %s1592_s12 = sshll.u32 %s2502_s9, 3  ;;  %325 = vst.msk [vmem:[#allocation2 + $0x70] sm:$0xff] %vm310_vm0, %v1879_v5  ;;  %326 = vst.msk [vmem:[#allocation2 + $0x78] sm:$0xff] %vm310_vm0, %v1879_v5  ;;  %v343_v48 = vld [vmem:[#allocation2] sm:$0xff]  ;;  %v344_v51 = vld [vmem:[#allocation2 + $0x8] sm:$0xff]  ;;  %s1495_s13 = sshll.u32 %s2502_s9, 2 }
  0x1a   : > { %688 = vmatpush1.bf16.msra.mxu0 %v1710_v3  ;;  %1637 = vmatpush1.bf16.msra.mxu1 %v1710_v3  ;;  %327 = vst.msk [vmem:[#allocation2 + $0x80] sm:$0xff] %vm310_vm0, %v1879_v5  ;;  %328 = vst.msk [vmem:[#allocation2 + $0x88] sm:$0xff] %vm310_vm0, %v1879_v5  ;;  %s2024_s21 = scalar_lea.vmem %s2487_s0, %s1592_s12  ;;  %v345_v0 = vld [vmem:[#allocation2 + $0x10] sm:$0xff]  ;;  %v346_v3 = vld [vmem:[#allocation2 + $0x18] sm:$0xff]  ;;  %s2112_s22 = scalar_lea.vmem %s2489_s2, %s1495_s13 }
  0x1b   : > { %689 = vmatprep.subr.bf16.mxu0 %v1878_v1  ;;  %1628 = vmatprep.subr.bf16.mxu1 %v1878_v1  ;;  %329 = vst.msk [vmem:[#allocation2 + $0x90] sm:$0xff] %vm310_vm0, %v1879_v5  ;;  %330 = vst.msk [vmem:[#allocation2 + $0x98] sm:$0xff] %vm310_vm0, %v1879_v5  ;;  %v1720_v7 = vld [vmem:[%s2024_s21 + $0x4] ss:$8 sps:$4 sm:$0xff]   ;;  %v1718_v18 = vld [vmem:[%s2024_s21] ss:$8 sps:$4 sm:$0xff]   ;;  %s2415_s12 = scalar_lea.hbm %s2491_s4, %s1588_s26 }
  0x1c   : > { %331 = vst.msk [vmem:[#allocation2 + $0xa0] sm:$0xff] %vm310_vm0, %v1879_v5  ;;  %332 = vst.msk [vmem:[#allocation2 + $0xa8] sm:$0xff] %vm310_vm0, %v1879_v5  ;;  %1538 = vmatprep.mubr.msk.bf16.mxu0 %vm627_vm1, %v1720_v7  ;;  %v1732_v9 = vld [vmem:[%s2024_s21 + $0x84] ss:$8 sps:$4 sm:$0xff]   ;;  %v1730_v19 = vld [vmem:[%s2024_s21 + $0x80] ss:$8 sps:$4 sm:$0xff]  }
  0x1d   : > { %333 = vst.msk [vmem:[#allocation2 + $0xb0] sm:$0xff] %vm310_vm0, %v1879_v5  ;;  %334 = vst.msk [vmem:[#allocation2 + $0xb8] sm:$0xff] %vm310_vm0, %v1879_v5  ;;  %1546 = vmatprep.mubr.msk.bf16.mxu1 %vm627_vm1, %v1732_v9  ;;  %v1721_v20 = vld [vmem:[%s2024_s21 + $0x14] ss:$8 sps:$4 sm:$0xff]   ;;  %v1723_v22 = vld [vmem:[%s2024_s21 + $0x10] ss:$8 sps:$4 sm:$0xff]  }
  0x1e   : > { %335 = vst.msk [vmem:[#allocation2 + $0xc0] sm:$0xff] %vm310_vm0, %v1879_v5  ;;  %336 = vst.msk [vmem:[#allocation2 + $0xc8] sm:$0xff] %vm310_vm0, %v1879_v5  ;;  %690 = vmatpush1.bf16.msra.mxu0 %v1711_v4  ;;  %1638 = vmatpush1.bf16.msra.mxu1 %v1711_v4  ;;  %v1736_v21 = vld [vmem:[%s2024_s21 + $0x94] ss:$8 sps:$4 sm:$0xff]   ;;  %v1738_v23 = vld [vmem:[%s2024_s21 + $0x90] ss:$8 sps:$4 sm:$0xff]  }
  0x1f   : > { %337 = vst.msk [vmem:[#allocation2 + $0xd0] sm:$0xff] %vm310_vm0, %v1879_v5  ;;  %338 = vst.msk [vmem:[#allocation2 + $0xd8] sm:$0xff] %vm310_vm0, %v1879_v5  ;;  %691 = vmatprep.subr.bf16.mxu0 %v1878_v1  ;;  %1629 = vmatprep.subr.bf16.mxu1 %v1878_v1  ;;  %v1724_v24 = vld [vmem:[%s2024_s21 + $0x24] ss:$8 sps:$4 sm:$0xff]   ;;  %v1726_v26 = vld [vmem:[%s2024_s21 + $0x20] ss:$8 sps:$4 sm:$0xff]  }
  0x20   : > { %339 = vst.msk [vmem:[#allocation2 + $0xe0] sm:$0xff] %vm310_vm0, %v1879_v5  ;;  %340 = vst.msk [vmem:[#allocation2 + $0xe8] sm:$0xff] %vm310_vm0, %v1879_v5  ;;  %v1742_v25 = vld [vmem:[%s2024_s21 + $0xa4] ss:$8 sps:$4 sm:$0xff]   ;;  %v1744_v27 = vld [vmem:[%s2024_s21 + $0xa0] ss:$8 sps:$4 sm:$0xff]  }
  0x21   : > { %341 = vst.msk [vmem:[#allocation2 + $0xf0] sm:$0xff] %vm310_vm0, %v1879_v5  ;;  %342 = vst.msk [vmem:[#allocation2 + $0xf8] sm:$0xff] %vm310_vm0, %v1879_v5  ;;  %v1727_v28 = vld [vmem:[%s2024_s21 + $0x34] ss:$8 sps:$4 sm:$0xff]   ;;  %v1729_v30 = vld [vmem:[%s2024_s21 + $0x30] ss:$8 sps:$4 sm:$0xff]  }
  0x22   : > { %692 = vmatpush1.bf16.msra.mxu0 %v1712_v6  ;;  %1639 = vmatpush1.bf16.msra.mxu1 %v1712_v6  ;;  %v1748_v29 = vld [vmem:[%s2024_s21 + $0xb4] ss:$8 sps:$4 sm:$0xff]   ;;  %v1750_v31 = vld [vmem:[%s2024_s21 + $0xb0] ss:$8 sps:$4 sm:$0xff]   ;;  %v1733_v32 = vld [vmem:[%s2024_s21 + $0x44] ss:$8 sps:$4 sm:$0xff]  }
  0x23   : > { %693 = vmatprep.subr.bf16.mxu0 %v1878_v1  ;;  %1630 = vmatprep.subr.bf16.mxu1 %v1878_v1  ;;  %v1754_v33 = vld [vmem:[%s2024_s21 + $0xc4] ss:$8 sps:$4 sm:$0xff]   ;;  %v1735_v34 = vld [vmem:[%s2024_s21 + $0x40] ss:$8 sps:$4 sm:$0xff]   ;;  %v1739_v36 = vld [vmem:[%s2024_s21 + $0x54] ss:$8 sps:$4 sm:$0xff]  }
  0x24   : > { %v1756_v35 = vld [vmem:[%s2024_s21 + $0xc0] ss:$8 sps:$4 sm:$0xff]   ;;  %v1757_v37 = vld [vmem:[%s2024_s21 + $0xd4] ss:$8 sps:$4 sm:$0xff]   ;;  %v1741_v38 = vld [vmem:[%s2024_s21 + $0x50] ss:$8 sps:$4 sm:$0xff]  }
  0x25   : > { %v1759_v39 = vld [vmem:[%s2024_s21 + $0xd0] ss:$8 sps:$4 sm:$0xff]   ;;  %v1745_v40 = vld [vmem:[%s2024_s21 + $0x64] ss:$8 sps:$4 sm:$0xff]   ;;  %v1747_v42 = vld [vmem:[%s2024_s21 + $0x60] ss:$8 sps:$4 sm:$0xff]  }
  0x26   : > { %694 = vmatpush1.bf16.msra.mxu0 %v1713_v8  ;;  %1640 = vmatpush1.bf16.msra.mxu1 %v1713_v8  ;;  %v1760_v41 = vld [vmem:[%s2024_s21 + $0xe4] ss:$8 sps:$4 sm:$0xff]   ;;  %v1762_v43 = vld [vmem:[%s2024_s21 + $0xe0] ss:$8 sps:$4 sm:$0xff]   ;;  %v1751_v44 = vld [vmem:[%s2024_s21 + $0x74] ss:$8 sps:$4 sm:$0xff]  }
  0x27   : > { %695 = vmatprep.subr.bf16.mxu0 %v1878_v1  ;;  %1631 = vmatprep.subr.bf16.mxu1 %v1878_v1  ;;  %v1763_v45 = vld [vmem:[%s2024_s21 + $0xf4] ss:$8 sps:$4 sm:$0xff]   ;;  %v1753_v46 = vld [vmem:[%s2024_s21 + $0x70] ss:$8 sps:$4 sm:$0xff]   ;;  %v359_v49 = vld [vmem:[#allocation2 + $0x80] sm:$0xff]  ;;  %s2396_s9 = sand.u32 1, %s1860_s16  }
  0x28   : > { %v1765_v47 = vld [vmem:[%s2024_s21 + $0xf0] ss:$8 sps:$4 sm:$0xff]   ;;  %v360_v53 = vld [vmem:[#allocation2 + $0x88] sm:$0xff]  ;;  %s1489_s24 = sshll.u32 %s2396_s9, 3  ;;  %s1286_s13 = scalar_lea.sflag [#allocation4], %s2396_s9 }
  0x29   : > { %v362_v9 = vld [vmem:[#allocation2 + $0x98] sm:$0xff]  ;;  %s267_s29 = scalar_lea.vmem [#allocation3], %s1489_s24  ;;  %s2401_s5 = scalar_lea.vmem [#allocation5], %s1489_s24 }
  0x2a   : > { %696 = vmatpush1.bf16.msra.mxu0 %v1714_v10  ;;  %1641 = vmatpush1.bf16.msra.mxu1 %v1714_v10  ;;  %s1309_s30 = sshll.u32 %s267_s29, 4  ;;  %s1323_s6 = sshll.u32 %s2401_s5, 4  ;;  %s2409_s30 = int_to_ptr.vmem [resolvable:$true] %s1309_s30  ;;  %s2417_s6 = int_to_ptr.vmem [resolvable:$true] %s1323_s6 }
  0x2b   : > { %697 = vmatprep.subr.bf16.mxu0 %v1878_v1  ;;  %1632 = vmatprep.subr.bf16.mxu1 %v1878_v1  ;;  %s1766_s14 = scalar_lea.vmem %s2409_s30, 128  ;;  %s1881_s21 = smov [#allocation3]  }
  0x2c   : > { %p1767_p12 = scmp.ne.s32.totalorder %s2409_s30, %s1766_s14 }
  0x2e   : > { %698 = vmatpush1.bf16.msra.mxu0 %v1715_v11  ;;  %1642 = vmatpush1.bf16.msra.mxu1 %v1715_v11  ;;  %p1768_p13 = pnand %p1767_p12, %p1948_p4 }
  0x2f   : > { %699 = vmatprep.subr.bf16.mxu0 %v1878_v1  ;;  %1633 = vmatprep.subr.bf16.mxu1 %v1878_v1 }
  0x30   : > { %p1769_p0 = pneg %p1768_p13 }
  0x32   : > { %700 = vmatpush1.bf16.msra.mxu0 %v1716_v14  ;;  %1643 = vmatpush1.bf16.msra.mxu1 %v1716_v14 }
  0x33   : > { %701 = vmatprep.subr.bf16.mxu0 %v1878_v1  ;;  %1634 = vmatprep.subr.bf16.mxu1 %v1878_v1  ;;  %v361_v1 = vld [vmem:[#allocation2 + $0x90] sm:$0xff] }
  0x36   : > { %702 = vmatpush1.bf16.msra.mxu0 %v681_v17  ;;  %1644 = vmatpush1.bf16.msra.mxu1 %v681_v17 }
  0x39   : > { %716 = vmatmul.mubr.bf16.vlgmr.msra.gmra.mrb[0].mxu0 %v1718_v18  ;;  %780 = vmatmul.mubr.bf16.vlgmr.msra.gmra.mrb[0].mxu1 %v1730_v19 }
  0x3a   : > { %1539 = vmatprep.mubr.msk.bf16.mxu0 %vm627_vm1, %v1721_v20  ;;  %1547 = vmatprep.mubr.msk.bf16.mxu1 %vm627_vm1, %v1736_v21 }
  0x41   : > { %724 = vmatmul.mubr.bf16.gmra.mrb[4].mxu0 %v1723_v22  ;;  %788 = vmatmul.mubr.bf16.gmra.mrb[4].mxu1 %v1738_v23  ;;  %v347_v23 = vld [vmem:[#allocation2 + $0x20] sm:$0xff] }
  0x42   : > { %1540 = vmatprep.mubr.msk.bf16.mxu0 %vm627_vm1, %v1724_v24  ;;  %1548 = vmatprep.mubr.msk.bf16.mxu1 %vm627_vm1, %v1742_v25  ;;  %v363_v25 = vld [vmem:[#allocation2 + $0xa0] sm:$0xff] }
  0x49   : > { %732 = vmatmul.mubr.bf16.gmra.mrb[8].mxu0 %v1726_v26  ;;  %796 = vmatmul.mubr.bf16.gmra.mrb[8].mxu1 %v1744_v27  ;;  %v348_v27 = vld [vmem:[#allocation2 + $0x28] sm:$0xff] }
  0x4a   : > { %1541 = vmatprep.mubr.msk.bf16.mxu0 %vm627_vm1, %v1727_v28  ;;  %1549 = vmatprep.mubr.msk.bf16.mxu1 %vm627_vm1, %v1748_v29 }
  0x51   : > { %740 = vmatmul.mubr.bf16.gmra.mrb[12].mxu0 %v1729_v30  ;;  %804 = vmatmul.mubr.bf16.gmra.mrb[12].mxu1 %v1750_v31 }
  0x52   : > { %1542 = vmatprep.mubr.msk.bf16.mxu0 %vm627_vm1, %v1733_v32  ;;  %1550 = vmatprep.mubr.msk.bf16.mxu1 %vm627_vm1, %v1754_v33 }
  0x59   : > { %748 = vmatmul.mubr.bf16.gmra.mrb[16].mxu0 %v1735_v34  ;;  %812 = vmatmul.mubr.bf16.gmra.mrb[16].mxu1 %v1756_v35 }
  0x5a   : > { %1543 = vmatprep.mubr.msk.bf16.mxu0 %vm627_vm1, %v1739_v36  ;;  %1551 = vmatprep.mubr.msk.bf16.mxu1 %vm627_vm1, %v1757_v37 }
  0x61   : > { %756 = vmatmul.mubr.bf16.gmra.mrb[20].mxu0 %v1741_v38  ;;  %820 = vmatmul.mubr.bf16.gmra.mrb[20].mxu1 %v1759_v39 }
  0x62   : > { %1544 = vmatprep.mubr.msk.bf16.mxu0 %vm627_vm1, %v1745_v40  ;;  %1552 = vmatprep.mubr.msk.bf16.mxu1 %vm627_vm1, %v1760_v41 }
  0x69   : > { %764 = vmatmul.mubr.bf16.gmra.mrb[24].mxu0 %v1747_v42  ;;  %828 = vmatmul.mubr.bf16.gmra.mrb[24].mxu1 %v1762_v43  ;;  %v364_v43 = vld [vmem:[#allocation2 + $0xa8] sm:$0xff] }
  0x6a   : > { %1545 = vmatprep.mubr.msk.bf16.mxu0 %vm627_vm1, %v1751_v44  ;;  %1553 = vmatprep.mubr.msk.bf16.mxu1 %vm627_vm1, %v1763_v45 }
  0x71   : > { %772 = vmatmul.mubr.bf16.gmra.mrb[28].mxu0 %v1753_v46  ;;  %836 = vmatmul.mubr.bf16.gmra.mrb[28].mxu1 %v1765_v47  ;;  %v349_v46 = vld [vmem:[#allocation2 + $0x30] sm:$0xff] }
 0x10c   : > { %v717_v50 = vpop.f32.mrb[0].mxu0  ;;  %v781_v52 = vpop.f32.mrb[0].mxu1 }
 0x10d   : > { %v844_v54 = vadd.f32 %v717_v50, %v343_v48  ;;  %v719_v55 = vpop.f32.mrb[1].mxu0  ;;  %v860_v56 = vadd.f32 %v781_v52, %v359_v49  ;;  %v783_v57 = vpop.f32.mrb[1].mxu1  ;;  %v365_v48 = vld [vmem:[#allocation2 + $0xb0] sm:$0xff] }
 0x10e   : > { %v720_v58 = vpop.f32.mrb[2].mxu0  ;;  %v784_v59 = vpop.f32.mrb[2].mxu1 }
 0x10f   : > { %877 = vst.msk [vmem:[#allocation2] sm:$0xff] %vm310_vm0, %v844_v54  ;;  %v845_v60 = vadd.f32 %v720_v58, %v344_v51  ;;  %v722_v61 = vpop.f32.mrb[3].mxu0  ;;  %893 = vst.msk [vmem:[#allocation2 + $0x80] sm:$0xff] %vm310_vm0, %v860_v56  ;;  %v861_v62 = vadd.f32 %v784_v59, %v360_v53  ;;  %v786_v63 = vpop.f32.mrb[3].mxu1  ;;  %v350_v51 = vld [vmem:[#allocation2 + $0x38] sm:$0xff] }
 0x110   : > { %v366_v58 = vld [vmem:[#allocation2 + $0xb8] sm:$0xff] }
 0x111   : > { %878 = vst.msk [vmem:[#allocation2 + $0x8] sm:$0xff] %vm310_vm0, %v845_v60  ;;  %894 = vst.msk [vmem:[#allocation2 + $0x88] sm:$0xff] %vm310_vm0, %v861_v62 }
 0x114   : > { %v725_v2 = vpop.f32.mrb[4].mxu0  ;;  %v789_v4 = vpop.f32.mrb[4].mxu1 }
 0x115   : > { %v846_v5 = vadd.f32 %v725_v2, %v345_v0  ;;  %v727_v6 = vpop.f32.mrb[5].mxu0  ;;  %v862_v7 = vadd.f32 %v789_v4, %v361_v1  ;;  %v791_v8 = vpop.f32.mrb[5].mxu1 }
 0x116   : > { %v2114_v10 = vld [vmem:[#allocation2] sm:$0xff]  ;;  %v728_v11 = vpop.f32.mrb[6].mxu0  ;;  %v792_v13 = vpop.f32.mrb[6].mxu1 }
 0x117   : > { %v2116_v12 = vld [vmem:[#allocation2 + $0x80] sm:$0xff]  ;;  %v1593_v14 = vpack.c.bf16 %v2114_v10, %v2114_v10  ;;  %879 = vst.msk [vmem:[#allocation2 + $0x10] sm:$0xff] %vm310_vm0, %v846_v5  ;;  %v847_v15 = vadd.f32 %v728_v11, %v346_v3  ;;  %v730_v16 = vpop.f32.mrb[7].mxu0  ;;  %895 = vst.msk [vmem:[#allocation2 + $0x90] sm:$0xff] %vm310_vm0, %v862_v7  ;;  %v794_v17 = vpop.f32.mrb[7].mxu1  ;;  %v863_v21 = vadd.f32 %v792_v13, %v362_v9  ;;  %v1105_v9 = vsel %vm310_vm0, %v2114_v10, 0.0 }
 0x118   : > { %v913_v18 = vld [vmem:[#allocation2 + $0x8] sm:$0xff]  ;;  %v1609_v19 = vpack.c.bf16 %v2116_v12, %v2116_v12  ;;  %v1174_v59 = vmul.f32 %v2114_v10, %v2114_v10  ;;  %v351_v16 = vld [vmem:[#allocation2 + $0x40] sm:$0xff] }
 0x119   : > { %v2124_v20 = vld [vmem:[#allocation2 + $0x88] sm:$0xff]  ;;  %1073 = vst.msk [vmem:[%s2112_s22] sm:$0xf] %vm1072_vm4, %v1593_v14  ;;  %v1594_v22 = vpack.c.bf16 %v913_v18, %v913_v18  ;;  %v1175_v53 = vmul.f32 %v913_v18, %v913_v18  ;;  %v1106_v0 = vsel %vm310_vm0, %v913_v18, 0.0  ;;  %v367_v17 = vld [vmem:[#allocation2 + $0xc0] sm:$0xff] }
 0x11a   : > { %880 = vst.msk [vmem:[#allocation2 + $0x18] sm:$0xff] %vm310_vm0, %v847_v15  ;;  %v1610_v24 = vpack.c.bf16 %v2124_v20, %v2124_v20  ;;  %896 = vst.msk [vmem:[#allocation2 + $0x98] sm:$0xff] %vm310_vm0, %v863_v21  ;;  %v1107_v15 = vadd.f32 %v1106_v0, %v1105_v9  ;;  %v1206_v10 = vsel %vm310_vm0, %v1174_v59, 0.0  ;;  %v369_v59 = vld [vmem:[#allocation2 + $0xd0] sm:$0xff] }
 0x11b   : > { %1089 = vst.msk [vmem:[%s2112_s22 + $0x40] sm:$0xf] %vm1072_vm4, %v1609_v19  ;;  %1074 = vst.msk [vmem:[%s2112_s22 + $0x4] sm:$0xf] %vm1072_vm4, %v1594_v22  ;;  %v1207_v11 = vsel %vm310_vm0, %v1175_v53, 0.0 }
 0x11c   : > { %v733_v26 = vpop.f32.mrb[8].mxu0  ;;  %1090 = vst.msk [vmem:[%s2112_s22 + $0x44] sm:$0xf] %vm1072_vm4, %v1610_v24  ;;  %v797_v28 = vpop.f32.mrb[8].mxu1  ;;  %v1208_v21 = vadd.f32 %v1207_v11, %v1206_v10 }
 0x11d   : > { %v848_v29 = vadd.f32 %v733_v26, %v347_v23  ;;  %v735_v30 = vpop.f32.mrb[9].mxu0  ;;  %v864_v31 = vadd.f32 %v797_v28, %v363_v25  ;;  %v799_v32 = vpop.f32.mrb[9].mxu1  ;;  %v352_v25 = vld [vmem:[#allocation2 + $0x48] sm:$0xff] }
 0x11e   : > { %v914_v33 = vld [vmem:[#allocation2 + $0x10] sm:$0xff]  ;;  %v736_v34 = vpop.f32.mrb[10].mxu0  ;;  %v800_v36 = vpop.f32.mrb[10].mxu1 }
 0x11f   : > { %v2138_v35 = vld [vmem:[#allocation2 + $0x90] sm:$0xff]  ;;  %v1595_v37 = vpack.c.bf16 %v914_v33, %v914_v33  ;;  %881 = vst.msk [vmem:[#allocation2 + $0x20] sm:$0xff] %vm310_vm0, %v848_v29  ;;  %v849_v38 = vadd.f32 %v736_v34, %v348_v27  ;;  %v738_v39 = vpop.f32.mrb[11].mxu0  ;;  %897 = vst.msk [vmem:[#allocation2 + $0xa0] sm:$0xff] %vm310_vm0, %v864_v31  ;;  %v802_v40 = vpop.f32.mrb[11].mxu1  ;;  %v865_v49 = vadd.f32 %v800_v36, %v364_v43  ;;  %v1108_v13 = vsel %vm310_vm0, %v914_v33, 0.0 }
 0x120   : > { %v1611_v42 = vpack.c.bf16 %v2138_v35, %v2138_v35  ;;  %v1176_v1 = vmul.f32 %v914_v33, %v914_v33  ;;  %v1109_v22 = vadd.f32 %v1108_v13, %v1107_v15  ;;  %v368_v33 = vld [vmem:[#allocation2 + $0xc8] sm:$0xff]  ;;  %v370_v13 = vld [vmem:[#allocation2 + $0xd8] sm:$0xff] }
 0x121   : > { %v915_v41 = vld [vmem:[#allocation2 + $0x18] sm:$0xff]  ;;  %1075 = vst.msk [vmem:[%s2112_s22 + $0x8] sm:$0xf] %vm1072_vm4, %v1595_v37 }
 0x122   : > { %v1596_v44 = vpack.c.bf16 %v915_v41, %v915_v41  ;;  %882 = vst.msk [vmem:[#allocation2 + $0x28] sm:$0xff] %vm310_vm0, %v849_v38  ;;  %v2147_v45 = vld [vmem:[#allocation2 + $0x98] sm:$0xff]  ;;  %898 = vst.msk [vmem:[#allocation2 + $0xa8] sm:$0xff] %vm310_vm0, %v865_v49  ;;  %v1209_v18 = vsel %vm310_vm0, %v1176_v1, 0.0  ;;  %v1177_v19 = vmul.f32 %v915_v41, %v915_v41  ;;  %v1110_v23 = vsel %vm310_vm0, %v915_v41, 0.0 }
 0x123   : > { %1091 = vst.msk [vmem:[%s2112_s22 + $0x48] sm:$0xf] %vm1072_vm4, %v1611_v42  ;;  %v1612_v47 = vpack.c.bf16 %v2147_v45, %v2147_v45  ;;  %v1210_v36 = vadd.f32 %v1209_v18, %v1208_v21 }
 0x124   : > { %1076 = vst.msk [vmem:[%s2112_s22 + $0xc] sm:$0xf] %vm1072_vm4, %v1596_v44  ;;  %v741_v50 = vpop.f32.mrb[12].mxu0  ;;  %v805_v52 = vpop.f32.mrb[12].mxu1  ;;  %v1211_v41 = vsel %vm310_vm0, %v1177_v19, 0.0 }
 0x125   : > { %1092 = vst.msk [vmem:[%s2112_s22 + $0x4c] sm:$0xf] %vm1072_vm4, %v1612_v47  ;;  %v850_v54 = vadd.f32 %v741_v50, %v349_v46  ;;  %v743_v55 = vpop.f32.mrb[13].mxu0  ;;  %v866_v56 = vadd.f32 %v805_v52, %v365_v48  ;;  %v807_v57 = vpop.f32.mrb[13].mxu1  ;;  %v1111_v48 = vadd.f32 %v1110_v23, %v1109_v22 }
 0x126   : > { %v916_v60 = vld [vmem:[#allocation2 + $0x20] sm:$0xff]  ;;  %v744_v61 = vpop.f32.mrb[14].mxu0  ;;  %v808_v63 = vpop.f32.mrb[14].mxu1 }
 0x127   : > { %v2160_v62 = vld [vmem:[#allocation2 + $0xa0] sm:$0xff]  ;;  %v1597_v2 = vpack.c.bf16 %v916_v60, %v916_v60  ;;  %883 = vst.msk [vmem:[#allocation2 + $0x30] sm:$0xff] %vm310_vm0, %v850_v54  ;;  %v851_v3 = vadd.f32 %v744_v61, %v350_v51  ;;  %v746_v4 = vpop.f32.mrb[15].mxu0  ;;  %899 = vst.msk [vmem:[#allocation2 + $0xb0] sm:$0xff] %vm310_vm0, %v866_v56  ;;  %v810_v5 = vpop.f32.mrb[15].mxu1  ;;  %v867_v8 = vadd.f32 %v808_v63, %v366_v58  ;;  %v1112_v42 = vsel %vm310_vm0, %v916_v60, 0.0 }
 0x128   : > { %v1613_v7 = vpack.c.bf16 %v2160_v62, %v2160_v62  ;;  %v1178_v28 = vmul.f32 %v916_v60, %v916_v60  ;;  %v1212_v56 = vadd.f32 %v1211_v41, %v1210_v36  ;;  %v1113_v57 = vadd.f32 %v1112_v42, %v1111_v48  ;;  %v353_v58 = vld [vmem:[#allocation2 + $0x50] sm:$0xff]  ;;  %v355_v36 = vld [vmem:[#allocation2 + $0x60] sm:$0xff] }
 0x129   : > { %v2165_v6 = vld [vmem:[#allocation2 + $0x28] sm:$0xff]  ;;  %1077 = vst.msk [vmem:[%s2112_s22 + $0x10] sm:$0xf] %vm1072_vm4, %v1597_v2  ;;  %v354_v2 = vld [vmem:[#allocation2 + $0x58] sm:$0xff] }
 0x12a   : > { %v1598_v14 = vpack.c.bf16 %v2165_v6, %v2165_v6  ;;  %884 = vst.msk [vmem:[#allocation2 + $0x38] sm:$0xff] %vm310_vm0, %v851_v3  ;;  %900 = vst.msk [vmem:[#allocation2 + $0xb8] sm:$0xff] %vm310_vm0, %v867_v8  ;;  %v2186_v27 = vld [vmem:[#allocation2 + $0xa8] sm:$0xff]  ;;  %v1213_v52 = vsel %vm310_vm0, %v1178_v28, 0.0  ;;  %v1179_v53 = vmul.f32 %v2165_v6, %v2165_v6  ;;  %v1114_v61 = vsel %vm310_vm0, %v2165_v6, 0.0 }
 0x12b   : > { %1093 = vst.msk [vmem:[%s2112_s22 + $0x50] sm:$0xf] %vm1072_vm4, %v1613_v7  ;;  %v1614_v34 = vpack.c.bf16 %v2186_v27, %v2186_v27  ;;  %v1214_v0 = vadd.f32 %v1213_v52, %v1212_v56 }
 0x12c   : > { %1078 = vst.msk [vmem:[%s2112_s22 + $0x14] sm:$0xf] %vm1072_vm4, %v1598_v14  ;;  %v749_v24 = vpop.f32.mrb[16].mxu0  ;;  %v813_v26 = vpop.f32.mrb[16].mxu1  ;;  %v1215_v4 = vsel %vm310_vm0, %v1179_v53, 0.0  ;;  %v1115_v14 = vadd.f32 %v1114_v61, %v1113_v57  ;;  %v372_v53 = vld [vmem:[#allocation2 + $0xe8] sm:$0xff] }
 0x12d   : > { %v852_v29 = vadd.f32 %v749_v24, %v351_v16  ;;  %v751_v30 = vpop.f32.mrb[17].mxu0  ;;  %v868_v31 = vadd.f32 %v813_v26, %v367_v17  ;;  %v815_v32 = vpop.f32.mrb[17].mxu1  ;;  %1094 = vst.msk [vmem:[%s2112_s22 + $0x54] sm:$0xf] %vm1072_vm4, %v1614_v34  ;;  %v1216_v24 = vadd.f32 %v1215_v4, %v1214_v0 }
 0x12e   : > { %v918_v37 = vld [vmem:[#allocation2 + $0x30] sm:$0xff]  ;;  %v752_v38 = vpop.f32.mrb[18].mxu0  ;;  %v816_v39 = vpop.f32.mrb[18].mxu1 }
 0x12f   : > { %v2190_v40 = vld [vmem:[#allocation2 + $0xb0] sm:$0xff]  ;;  %v1599_v43 = vpack.c.bf16 %v918_v37, %v918_v37  ;;  %885 = vst.msk [vmem:[#allocation2 + $0x40] sm:$0xff] %vm310_vm0, %v852_v29  ;;  %v853_v44 = vadd.f32 %v752_v38, %v352_v25  ;;  %v754_v46 = vpop.f32.mrb[19].mxu0  ;;  %901 = vst.msk [vmem:[#allocation2 + $0xc0] sm:$0xff] %vm310_vm0, %v868_v31  ;;  %v818_v47 = vpop.f32.mrb[19].mxu1  ;;  %v869_v50 = vadd.f32 %v816_v39, %v368_v33  ;;  %v1116_v5 = vsel %vm310_vm0, %v918_v37, 0.0 }
 0x130   : > { %v1615_v51 = vpack.c.bf16 %v2190_v40, %v2190_v40  ;;  %v1180_v63 = vmul.f32 %v918_v37, %v918_v37  ;;  %v1117_v25 = vadd.f32 %v1116_v5, %v1115_v14  ;;  %v371_v37 = vld [vmem:[#allocation2 + $0xe0] sm:$0xff] }
 0x131   : > { %v919_v49 = vld [vmem:[#allocation2 + $0x38] sm:$0xff]  ;;  %1079 = vst.msk [vmem:[%s2112_s22 + $0x18] sm:$0xf] %vm1072_vm4, %v1599_v43 }
 0x132   : > { %v1600_v54 = vpack.c.bf16 %v919_v49, %v919_v49  ;;  %886 = vst.msk [vmem:[#allocation2 + $0x48] sm:$0xff] %vm310_vm0, %v853_v44  ;;  %v2206_v55 = vld [vmem:[#allocation2 + $0xb8] sm:$0xff]  ;;  %902 = vst.msk [vmem:[#allocation2 + $0xc8] sm:$0xff] %vm310_vm0, %v869_v50  ;;  %v1217_v10 = vsel %vm310_vm0, %v1180_v63, 0.0  ;;  %v1181_v18 = vmul.f32 %v919_v49, %v919_v49  ;;  %v1118_v30 = vsel %vm310_vm0, %v919_v49, 0.0  ;;  %v356_v44 = vld [vmem:[#allocation2 + $0x68] sm:$0xff] }
 0x133   : > { %v1616_v60 = vpack.c.bf16 %v2206_v55, %v2206_v55  ;;  %1095 = vst.msk [vmem:[%s2112_s22 + $0x58] sm:$0xf] %vm1072_vm4, %v1615_v51  ;;  %v1218_v34 = vadd.f32 %v1217_v10, %v1216_v24  ;;  %v1119_v42 = vadd.f32 %v1118_v30, %v1117_v25  ;;  %v373_v10 = vld [vmem:[#allocation2 + $0xf0] sm:$0xff]  ;;  %v358_v24 = vld [vmem:[#allocation2 + $0x78] sm:$0xff] }
 0x134   : > { %1080 = vst.msk [vmem:[%s2112_s22 + $0x1c] sm:$0xf] %vm1072_vm4, %v1600_v54  ;;  %v757_v1 = vpop.f32.mrb[20].mxu0  ;;  %v821_v3 = vpop.f32.mrb[20].mxu1  ;;  %v1219_v39 = vsel %vm310_vm0, %v1181_v18, 0.0 }
 0x135   : > { %1096 = vst.msk [vmem:[%s2112_s22 + $0x5c] sm:$0xf] %vm1072_vm4, %v1616_v60  ;;  %v854_v7 = vadd.f32 %v757_v1, %v353_v58  ;;  %v759_v8 = vpop.f32.mrb[21].mxu0  ;;  %v870_v9 = vadd.f32 %v821_v3, %v369_v59  ;;  %v823_v11 = vpop.f32.mrb[21].mxu1  ;;  %v1220_v54 = vadd.f32 %v1219_v39, %v1218_v34 }
 0x136   : > { %v920_v6 = vld [vmem:[#allocation2 + $0x40] sm:$0xff]  ;;  %v760_v15 = vpop.f32.mrb[22].mxu0  ;;  %v824_v16 = vpop.f32.mrb[22].mxu1 }
 0x137   : > { %v2221_v17 = vld [vmem:[#allocation2 + $0xc0] sm:$0xff]  ;;  %v1601_v19 = vpack.c.bf16 %v920_v6, %v920_v6  ;;  %887 = vst.msk [vmem:[#allocation2 + $0x50] sm:$0xff] %vm310_vm0, %v854_v7  ;;  %v855_v21 = vadd.f32 %v760_v15, %v354_v2  ;;  %v762_v22 = vpop.f32.mrb[23].mxu0  ;;  %903 = vst.msk [vmem:[#allocation2 + $0xd0] sm:$0xff] %vm310_vm0, %v870_v9  ;;  %v826_v23 = vpop.f32.mrb[23].mxu1  ;;  %v871_v28 = vadd.f32 %v824_v16, %v370_v13  ;;  %v1120_v41 = vsel %vm310_vm0, %v920_v6, 0.0 }
 0x138   : > { %v1617_v29 = vpack.c.bf16 %v2221_v17, %v2221_v17  ;;  %v1182_v31 = vmul.f32 %v920_v6, %v920_v6  ;;  %v1121_v56 = vadd.f32 %v1120_v41, %v1119_v42  ;;  %v357_v16 = vld [vmem:[#allocation2 + $0x70] sm:$0xff] }
 0x139   : > { %v921_v26 = vld [vmem:[#allocation2 + $0x48] sm:$0xff]  ;;  %1081 = vst.msk [vmem:[%s2112_s22 + $0x20] sm:$0xf] %vm1072_vm4, %v1601_v19 }
 0x13a   : > { %v1602_v32 = vpack.c.bf16 %v921_v26, %v921_v26  ;;  %888 = vst.msk [vmem:[#allocation2 + $0x58] sm:$0xff] %vm310_vm0, %v855_v21  ;;  %v2232_v33 = vld [vmem:[#allocation2 + $0xc8] sm:$0xff]  ;;  %904 = vst.msk [vmem:[#allocation2 + $0xd8] sm:$0xff] %vm310_vm0, %v871_v28  ;;  %v1221_v47 = vsel %vm310_vm0, %v1182_v31, 0.0  ;;  %v1183_v48 = vmul.f32 %v921_v26, %v921_v26  ;;  %v1122_v61 = vsel %vm310_vm0, %v921_v26, 0.0 }
 0x13b   : > { %v1618_v38 = vpack.c.bf16 %v2232_v33, %v2232_v33  ;;  %1097 = vst.msk [vmem:[%s2112_s22 + $0x60] sm:$0xf] %vm1072_vm4, %v1617_v29  ;;  %v1222_v4 = vadd.f32 %v1221_v47, %v1220_v54  ;;  %v1123_v6 = vadd.f32 %v1122_v61, %v1121_v56 }
 0x13c   : > { %1082 = vst.msk [vmem:[%s2112_s22 + $0x24] sm:$0xf] %vm1072_vm4, %v1602_v32  ;;  %v765_v43 = vpop.f32.mrb[24].mxu0  ;;  %v829_v46 = vpop.f32.mrb[24].mxu1  ;;  %v1223_v9 = vsel %vm310_vm0, %v1183_v48, 0.0  ;;  %v374_v32 = vld [vmem:[#allocation2 + $0xf8] sm:$0xff] }
 0x13d   : > { %1098 = vst.msk [vmem:[%s2112_s22 + $0x64] sm:$0xf] %vm1072_vm4, %v1618_v38  ;;  %v856_v49 = vadd.f32 %v765_v43, %v355_v36  ;;  %v767_v50 = vpop.f32.mrb[25].mxu0  ;;  %v872_v51 = vadd.f32 %v829_v46, %v371_v37  ;;  %v831_v52 = vpop.f32.mrb[25].mxu1  ;;  %v1224_v21 = vadd.f32 %v1223_v9, %v1222_v4 }
 0x13e   : > { %v922_v57 = vld [vmem:[#allocation2 + $0x50] sm:$0xff]  ;;  %v768_v58 = vpop.f32.mrb[26].mxu0  ;;  %v832_v59 = vpop.f32.mrb[26].mxu1 }
 0x13f   : > { %v2246_v60 = vld [vmem:[#allocation2 + $0xd0] sm:$0xff]  ;;  %v1603_v63 = vpack.c.bf16 %v922_v57, %v922_v57  ;;  %v1184_v0 = vmul.f32 %v922_v57, %v922_v57  ;;  %889 = vst.msk [vmem:[#allocation2 + $0x60] sm:$0xff] %vm310_vm0, %v856_v49  ;;  %v857_v1 = vadd.f32 %v768_v58, %v356_v44  ;;  %v770_v2 = vpop.f32.mrb[27].mxu0  ;;  %905 = vst.msk [vmem:[#allocation2 + $0xe0] sm:$0xff] %vm310_vm0, %v872_v51  ;;  %v834_v3 = vpop.f32.mrb[27].mxu1  ;;  %v1124_v11 = vsel %vm310_vm0, %v922_v57, 0.0 }
 0x140   : > { %v873_v7 = vadd.f32 %v832_v59, %v372_v53  ;;  %v1619_v8 = vpack.c.bf16 %v2246_v60, %v2246_v60  ;;  %v1125_v22 = vadd.f32 %v1124_v11, %v1123_v6  ;;  %v1190_v11 = vmul.f32 %v2116_v12, %v2116_v12 }
 0x141   : > { %v923_v5 = vld [vmem:[#allocation2 + $0x58] sm:$0xff]  ;;  %1083 = vst.msk [vmem:[%s2112_s22 + $0x28] sm:$0xf] %vm1072_vm4, %v1603_v63  ;;  %v1225_v19 = vsel %vm310_vm0, %v1184_v0, 0.0 }
 0x142   : > { %v1604_v13 = vpack.c.bf16 %v923_v5, %v923_v5  ;;  %890 = vst.msk [vmem:[#allocation2 + $0x68] sm:$0xff] %vm310_vm0, %v857_v1  ;;  %v2258_v14 = vld [vmem:[#allocation2 + $0xd8] sm:$0xff]  ;;  %v1185_v15 = vmul.f32 %v923_v5, %v923_v5  ;;  %906 = vst.msk [vmem:[#allocation2 + $0xe8] sm:$0xff] %vm310_vm0, %v873_v7  ;;  %v1126_v26 = vsel %vm310_vm0, %v923_v5, 0.0  ;;  %v1226_v34 = vadd.f32 %v1225_v19, %v1224_v21 }
 0x143   : > { %v1620_v18 = vpack.c.bf16 %v2258_v14, %v2258_v14  ;;  %1099 = vst.msk [vmem:[%s2112_s22 + $0x68] sm:$0xf] %vm1072_vm4, %v1619_v8  ;;  %v1127_v49 = vadd.f32 %v1126_v26, %v1125_v22  ;;  %v1191_v26 = vmul.f32 %v2124_v20, %v2124_v20 }
 0x144   : > { %1084 = vst.msk [vmem:[%s2112_s22 + $0x2c] sm:$0xf] %vm1072_vm4, %v1604_v13  ;;  %v773_v23 = vpop.f32.mrb[28].mxu0  ;;  %v837_v25 = vpop.f32.mrb[28].mxu1  ;;  %v1227_v36 = vsel %vm310_vm0, %v1185_v15, 0.0 }
 0x145   : > { %1100 = vst.msk [vmem:[%s2112_s22 + $0x6c] sm:$0xf] %vm1072_vm4, %v1620_v18  ;;  %v858_v28 = vadd.f32 %v773_v23, %v357_v16  ;;  %v775_v29 = vpop.f32.mrb[29].mxu0  ;;  %v874_v30 = vadd.f32 %v837_v25, %v373_v10  ;;  %v839_v31 = vpop.f32.mrb[29].mxu1  ;;  %v1228_v58 = vadd.f32 %v1227_v36, %v1226_v34  ;;  %v1136_v25 = vsel %vm310_vm0, %v2116_v12, 0.0 }
 0x146   : > { %v924_v37 = vld [vmem:[#allocation2 + $0x60] sm:$0xff]  ;;  %v776_v38 = vpop.f32.mrb[30].mxu0  ;;  %v840_v39 = vpop.f32.mrb[30].mxu1  ;;  %v1237_v31 = vsel %vm310_vm0, %v1190_v11, 0.0  ;;  %v1192_v34 = vmul.f32 %v2138_v35, %v2138_v35 }
 0x147   : > { %v2272_v41 = vld [vmem:[#allocation2 + $0xe0] sm:$0xff]  ;;  %v1605_v42 = vpack.c.bf16 %v924_v37, %v924_v37  ;;  %v1128_v43 = vsel %vm310_vm0, %v924_v37, 0.0  ;;  %v1186_v44 = vmul.f32 %v924_v37, %v924_v37  ;;  %891 = vst.msk [vmem:[#allocation2 + $0x70] sm:$0xff] %vm310_vm0, %v858_v28  ;;  %v859_v46 = vadd.f32 %v776_v38, %v358_v24  ;;  %v778_v47 = vpop.f32.mrb[31].mxu0  ;;  %907 = vst.msk [vmem:[#allocation2 + $0xf0] sm:$0xff] %vm310_vm0, %v874_v30  ;;  %v842_v48 = vpop.f32.mrb[31].mxu1 }
 0x148   : > { %v875_v51 = vadd.f32 %v840_v39, %v374_v32  ;;  %v1621_v52 = vpack.c.bf16 %v2272_v41, %v2272_v41  ;;  %v1129_v59 = vadd.f32 %v1128_v43, %v1127_v49  ;;  %v1138_v32 = vsel %vm310_vm0, %v2124_v20, 0.0 }
 0x149   : > { %v925_v50 = vld [vmem:[#allocation2 + $0x68] sm:$0xff]  ;;  %1085 = vst.msk [vmem:[%s2112_s22 + $0x30] sm:$0xf] %vm1072_vm4, %v1605_v42  ;;  %v1229_v53 = vsel %vm310_vm0, %v1186_v44, 0.0  ;;  %v1239_v37 = vsel %vm310_vm0, %v1191_v26, 0.0  ;;  %v1140_v38 = vsel %vm310_vm0, %v2138_v35, 0.0  ;;  %v1193_v39 = vmul.f32 %v2147_v45, %v2147_v45 }
 0x14a   : > { %v1606_v54 = vpack.c.bf16 %v925_v50, %v925_v50  ;;  %v1187_v56 = vmul.f32 %v925_v50, %v925_v50  ;;  %892 = vst.msk [vmem:[#allocation2 + $0x78] sm:$0xff] %vm310_vm0, %v859_v46  ;;  %v2283_v57 = vld [vmem:[#allocation2 + $0xe8] sm:$0xff]  ;;  %908 = vst.msk [vmem:[#allocation2 + $0xf8] sm:$0xff] %vm310_vm0, %v875_v51  ;;  %v1130_v63 = vsel %vm310_vm0, %v925_v50, 0.0  ;;  %v1230_v0 = vadd.f32 %v1229_v53, %v1228_v58 }
 0x14b   : > { %v1622_v61 = vpack.c.bf16 %v2283_v57, %v2283_v57  ;;  %1101 = vst.msk [vmem:[%s2112_s22 + $0x70] sm:$0xf] %vm1072_vm4, %v1621_v52  ;;  %v1131_v2 = vadd.f32 %v1130_v63, %v1129_v59  ;;  %v1142_v44 = vsel %vm310_vm0, %v2147_v45, 0.0  ;;  %v1194_v20 = vmul.f32 %v2160_v62, %v2160_v62 }
 0x14c   : > { %1086 = vst.msk [vmem:[%s2112_s22 + $0x34] sm:$0xf] %vm1072_vm4, %v1606_v54  ;;  %v1231_v1 = vsel %vm310_vm0, %v1187_v56, 0.0  ;;  %v1241_v46 = vsel %vm310_vm0, %v1192_v34, 0.0  ;;  %v1144_v49 = vsel %vm310_vm0, %v2160_v62, 0.0  ;;  %v1195_v35 = vmul.f32 %v2186_v27, %v2186_v27 }
 0x14d   : > { %1102 = vst.msk [vmem:[%s2112_s22 + $0x74] sm:$0xf] %vm1072_vm4, %v1622_v61  ;;  %v1232_v13 = vadd.f32 %v1231_v1, %v1230_v0  ;;  %v1243_v50 = vsel %vm310_vm0, %v1193_v39, 0.0  ;;  %v1146_v45 = vsel %vm310_vm0, %v2186_v27, 0.0  ;;  %v1196_v53 = vmul.f32 %v2190_v40, %v2190_v40 }
 0x14e   : > { %v926_v3 = vld [vmem:[#allocation2 + $0x70] sm:$0xff]  ;;  %v1245_v54 = vsel %vm310_vm0, %v1194_v20, 0.0  ;;  %v1148_v62 = vsel %vm310_vm0, %v2190_v40, 0.0  ;;  %v1197_v59 = vmul.f32 %v2206_v55, %v2206_v55  ;;  %v1247_v61 = vsel %vm310_vm0, %v1195_v35, 0.0 }
 0x14f   : > { %v2296_v4 = vld [vmem:[#allocation2 + $0xf0] sm:$0xff]  ;;  %v1607_v5 = vpack.c.bf16 %v926_v3, %v926_v3  ;;  %v1132_v7 = vsel %vm310_vm0, %v926_v3, 0.0  ;;  %v1188_v8 = vmul.f32 %v926_v3, %v926_v3  ;;  %v1150_v27 = vsel %vm310_vm0, %v2206_v55, 0.0 }
 0x150   : > { %v1623_v9 = vpack.c.bf16 %v2296_v4, %v2296_v4  ;;  %v1133_v6 = vadd.f32 %v1132_v7, %v1131_v2  ;;  %v1198_v1 = vmul.f32 %v2221_v17, %v2221_v17  ;;  %v1249_v2 = vsel %vm310_vm0, %v1196_v53, 0.0 }
 0x151   : > { %v927_v15 = vld [vmem:[#allocation2 + $0x78] sm:$0xff]  ;;  %1087 = vst.msk [vmem:[%s2112_s22 + $0x38] sm:$0xf] %vm1072_vm4, %v1607_v5  ;;  %v1233_v16 = vsel %vm310_vm0, %v1188_v8, 0.0  ;;  %v1152_v40 = vsel %vm310_vm0, %v2221_v17, 0.0  ;;  %v1199_v7 = vmul.f32 %v2232_v33, %v2232_v33  ;;  %v1251_v8 = vsel %vm310_vm0, %v1197_v59, 0.0 }
 0x152   : > { %v1608_v10 = vpack.c.bf16 %v927_v15, %v927_v15  ;;  %v1134_v18 = vsel %vm310_vm0, %v927_v15, 0.0  ;;  %v1189_v19 = vmul.f32 %v927_v15, %v927_v15  ;;  %v2307_v21 = vld [vmem:[#allocation2 + $0xf8] sm:$0xff]  ;;  %1103 = vst.msk [vmem:[%s2112_s22 + $0x78] sm:$0xf] %vm1072_vm4, %v1623_v9  ;;  %v1234_v22 = vadd.f32 %v1233_v16, %v1232_v13 }
 0x153   : > { %v1135_v23 = vadd.f32 %v1134_v18, %v1133_v6  ;;  %v1624_v24 = vpack.c.bf16 %v2307_v21, %v2307_v21  ;;  %v1154_v55 = vsel %vm310_vm0, %v2232_v33, 0.0  ;;  %v1200_v13 = vmul.f32 %v2246_v60, %v2246_v60 }
 0x154   : > { %1088 = vst.msk [vmem:[%s2112_s22 + $0x3c] sm:$0xf] %vm1072_vm4, %v1608_v10  ;;  %v1235_v28 = vsel %vm310_vm0, %v1189_v19, 0.0  ;;  %v1253_v6 = vsel %vm310_vm0, %v1198_v1, 0.0  ;;  %v1156_v17 = vsel %vm310_vm0, %v2246_v60, 0.0  ;;  %v1201_v10 = vmul.f32 %v2258_v14, %v2258_v14 }
 0x155   : > { %v1137_v29 = vadd.f32 %v1136_v25, %v1135_v23  ;;  %v1236_v30 = vadd.f32 %v1235_v28, %v1234_v22  ;;  %1104 = vst.msk [vmem:[%s2112_s22 + $0x7c] sm:$0xf] %vm1072_vm4, %v1624_v24  ;;  %v1255_v18 = vsel %vm310_vm0, %v1199_v7, 0.0  ;;  %v1158_v33 = vsel %vm310_vm0, %v2258_v14, 0.0  ;;  %s1770_s22 = sshll.u32 %s1881_s21, 4  ;;  %s1771_s22 = int_to_ptr.vmem [resolvable:$false] %s1770_s22 }
 0x156   : > { %v1202_v23 = vmul.f32 %v2272_v41, %v2272_v41  ;;  %v1257_v24 = vsel %vm310_vm0, %v1200_v13, 0.0  ;;  %v1160_v60 = vsel %vm310_vm0, %v2272_v41, 0.0  ;;  %v1203_v28 = vmul.f32 %v2283_v57, %v2283_v57  ;;  %s1772_s24 = scalar_lea.vmem %s1771_s22, 256  ;;  %p1773_p1 = scmp.lt.s32.totalorder %s2409_s30, %s1771_s22 }
 0x157   : > { %v1139_v12 = vadd.f32 %v1138_v32, %v1137_v29  ;;  %v1238_v36 = vadd.f32 %v1237_v31, %v1236_v30  ;;  %v1204_v29 = vmul.f32 %v2296_v4, %v2296_v4  ;;  %v1259_v30 = vsel %vm310_vm0, %v1201_v10, 0.0  ;;  %p1774_p2 = scmp.lt.s32.totalorder %s1772_s24, %s1766_s14 }
 0x158   : > { %v1162_v32 = vsel %vm310_vm0, %v2283_v57, 0.0  ;;  %v1164_v34 = vsel %vm310_vm0, %v2296_v4, 0.0  ;;  %v1166_v57 = vsel %vm310_vm0, %v2307_v21, 0.0 }
 0x159   : > { %v1141_v42 = vadd.f32 %v1140_v38, %v1139_v12  ;;  %v1240_v43 = vadd.f32 %v1239_v37, %v1238_v36  ;;  %v1261_v12 = vsel %vm310_vm0, %v1202_v23, 0.0  ;;  %v1205_v37 = vmul.f32 %v2307_v21, %v2307_v21  ;;  %p1775_p3 = por %p1774_p2, %p1773_p1 }
 0x15a   : > { %v1263_v38 = vsel %vm310_vm0, %v1203_v28, 0.0  ;;  %v1265_v39 = vsel %vm310_vm0, %v1204_v29, 0.0 }
 0x15b   : > { %v1143_v47 = vadd.f32 %v1142_v44, %v1141_v42  ;;  %v1242_v48 = vadd.f32 %v1241_v46, %v1240_v43  ;;  %v1267_v20 = vsel %vm310_vm0, %v1205_v37, 0.0  ;;  %p1776_p5 = pnand %p1775_p3, %p1769_p0 }
 0x15d   : > { %v1145_v51 = vadd.f32 %v1144_v49, %v1143_v47  ;;  %v1244_v52 = vadd.f32 %v1243_v50, %v1242_v48 }
 0x15f   : > { %v1147_v56 = vadd.f32 %v1146_v45, %v1145_v51  ;;  %v1246_v58 = vadd.f32 %v1245_v54, %v1244_v52 }
 0x161   : > { %v1149_v63 = vadd.f32 %v1148_v62, %v1147_v56  ;;  %v1248_v0 = vadd.f32 %v1247_v61, %v1246_v58 }
 0x163   : > { %v1151_v3 = vadd.f32 %v1150_v27, %v1149_v63  ;;  %v1250_v5 = vadd.f32 %v1249_v2, %v1248_v0 }
 0x165   : > { %v1153_v9 = vadd.f32 %v1152_v40, %v1151_v3  ;;  %v1252_v11 = vadd.f32 %v1251_v8, %v1250_v5 }
 0x167   : > { %v1155_v15 = vadd.f32 %v1154_v55, %v1153_v9  ;;  %v1254_v16 = vadd.f32 %v1253_v6, %v1252_v11 }
 0x169   : > { %v1157_v19 = vadd.f32 %v1156_v17, %v1155_v15  ;;  %v1256_v22 = vadd.f32 %v1255_v18, %v1254_v16 }
 0x16b   : > { %v1159_v25 = vadd.f32 %v1158_v33, %v1157_v19  ;;  %v1258_v26 = vadd.f32 %v1257_v24, %v1256_v22 }
 0x16d   : > { %v1161_v14 = vadd.f32 %v1160_v60, %v1159_v25  ;;  %v1260_v31 = vadd.f32 %v1259_v30, %v1258_v26 }
 0x16f   : > { %v1163_v41 = vadd.f32 %v1162_v32, %v1161_v14  ;;  %v1262_v36 = vadd.f32 %v1261_v12, %v1260_v31 }
 0x171   : > { %v1165_v42 = vadd.f32 %v1164_v34, %v1163_v41  ;;  %v1264_v43 = vadd.f32 %v1263_v38, %v1262_v36 }
 0x173   : > { %v1167_v4 = vadd.f32 %v1166_v57, %v1165_v42  ;;  %v1266_v44 = vadd.f32 %v1265_v39, %v1264_v43 }
 0x175   : > { %v1168_v46 = vrot.slane %v1167_v4, 4  ;;  %v1268_v47 = vadd.f32 %v1267_v20, %v1266_v44 }
 0x177   : > { %v1169_v48 = vadd.f32 %v1168_v46, %v1167_v4  ;;  %v1269_v49 = vrot.slane %v1268_v47, 4 }
 0x179   : > { %v1170_v35 = vrot.slane %v1169_v48, 2  ;;  %v1270_v50 = vadd.f32 %v1269_v49, %v1268_v47 }
 0x17b   : > { %v1171_v51 = vadd.f32 %v1170_v35, %v1169_v48  ;;  %v1271_v52 = vrot.slane %v1270_v50, 2 }
 0x17d   : > { %v1172_v21 = vrot.slane %v1171_v51, 1  ;;  %v1272_v45 = vadd.f32 %v1271_v52, %v1270_v50 }
 0x17f   : > { %v1173_v53 = vadd.f32 %v1172_v21, %v1171_v51  ;;  %v1273_v54 = vrot.slane %v1272_v45, 1 }
 0x181   : > { %1275 = vst.msk [vmem:[%s267_s29] sm:$0xff] %vm310_vm0, %v1173_v53  ;;  %v1274_v56 = vadd.f32 %v1273_v54, %v1272_v45 }
 0x182   : > { %1779 = shalt.err (!%p1776_p5)
}
 0x183   : > { %s1780_s26 = scalar_lea.hbm %s2407_s10, 128  ;;  %s1784_s8 = scalar_lea.hbm %s2490_s3, 256 }
 0x184   : > { %p1781_p6 = scmp.ne.s32.totalorder %s2407_s10, %s1780_s26  ;;  %p1785_p10 = scmp.lt.u32.totalorder %s2407_s10, %s2490_s3 }
 0x185   : > { %p1786_p11 = scmp.lt.u32.totalorder %s1784_s8, %s1780_s26  ;;  %p1788_p13 = scmp.lt.u32.totalorder %s1780_s26, %s2407_s10 }
 0x186   : > { %p1782_p7 = pnand %p1781_p6, %p1948_p4 }
 0x187   : > { %p1787_p12 = por %p1786_p11, %p1785_p10 }
 0x188   : > { %p1783_p9 = pneg %p1782_p7 }
 0x189   : > { %p1789_p0 = por %p1788_p13, %p1787_p12 }
 0x18b   : > { %p1790_p1 = pnand %p1789_p0, %p1783_p9 }
 0x18d   : > { %1793 = shalt.err (!%p1790_p1)
}
 0x18e   : > { %1645 = dma.vmem_to_hbm [thread:$0]  (%p1948_p4), %s2409_s30, 128, %s2407_s10, %s1286_s13   ;;  %1276 = vst.msk [vmem:[%s2401_s5] sm:$0xff] %vm310_vm0, %v1274_v56 }
 0x18f   : > { %s1291_s14 = scalar_lea.sflag [#allocation6], %s2396_s9  ;;  %s1794_s21 = scalar_lea.vmem %s2417_s6, 128 }
 0x190   : > { %p1795_p2 = scmp.ne.s32.totalorder %s2417_s6, %s1794_s21  ;;  %s1882_s22 = smov [#allocation5]  }
 0x191   : > { %s1798_s24 = sshll.u32 %s1882_s22, 4  ;;  %s1799_s24 = int_to_ptr.vmem [resolvable:$false] %s1798_s24 }
 0x192   : > { %p1796_p3 = pnand %p1795_p2, %p1948_p4  ;;  %s1800_s26 = scalar_lea.vmem %s1799_s24, 256 }
 0x193   : > { %p1801_p6 = scmp.lt.s32.totalorder %s2417_s6, %s1799_s24  ;;  %p1802_p7 = scmp.lt.s32.totalorder %s1800_s26, %s1794_s21 }
 0x194   : > { %p1797_p5 = pneg %p1796_p3 }
 0x195   : > { %p1803_p9 = por %p1802_p7, %p1801_p6 }
 0x197   : > { %p1804_p10 = pnand %p1803_p9, %p1797_p5 }
 0x199   : > { %1807 = shalt.err (!%p1804_p10)
}
 0x19a   : > { %s1808_s9 = scalar_lea.hbm %s2415_s12, 128  ;;  %s1812_s10 = scalar_lea.hbm %s2491_s4, 256 }
 0x19b   : > { %p1809_p11 = scmp.ne.s32.totalorder %s2415_s12, %s1808_s9  ;;  %p1813_p0 = scmp.lt.u32.totalorder %s2415_s12, %s2491_s4 }
 0x19c   : > { %p1814_p1 = scmp.lt.u32.totalorder %s1812_s10, %s1808_s9  ;;  %p1816_p3 = scmp.lt.u32.totalorder %s1808_s9, %s2415_s12 }
 0x19d   : > { %p1810_p12 = pnand %p1809_p11, %p1948_p4 }
 0x19e   : > { %p1815_p2 = por %p1814_p1, %p1813_p0 }
 0x19f   : > { %p1811_p13 = pneg %p1810_p12 }
 0x1a0   : > { %p1817_p5 = por %p1816_p3, %p1815_p2 }
 0x1a2   : > { %p1818_p6 = pnand %p1817_p5, %p1811_p13 }
 0x1a4   : > { %1821 = shalt.err (!%p1818_p6)
}
 0x1a5   : > { %1646 = dma.vmem_to_hbm [thread:$0]  (%p1948_p4), %s2417_s6, 128, %s2415_s12, %s1291_s14  }
 0x1a6 PF: > { %p1656_p7 = scmp.ge.s32.totalorder %s1876_s20, 2  ;;  %s1346_s7 = sand.u32 1, %s1856_s15  }
 0x1a7   : > { %s1347_s8 = scalar_lea.sflag [#allocation4], %s1346_s7 }
 0x1a8   : > { %p1650_p9 = pnand %p1656_p7, %p1955_p8 }
 0x1aa   : > { %1847 = dma.done.wait (!%p1650_p9), %s1347_s8, 128  }
 0x1ab   : > { %1849 = vsyncadd (!%p1650_p9), %s1347_s8, 4294967168  ;;  %s1356_s18 = scalar_lea.sflag [#allocation6], %s1346_s7 }
 0x1ac   : > { %1851 = dma.done.wait (!%p1650_p9), %s1356_s18, 128  }
 0x1ad   : > { %1853 = vsyncadd (!%p1650_p9), %s1356_s18, 4294967168  ;;  %s21_s20 = sadd.s32 1, %s1876_s20   ;;  %s2494_s15 = smov %s1860_s16 }
 0x1ae   : > { %p18_p10 = scmp.ge.s32.totalorder %s21_s20, 4   ;;  %s2495_s16 = smov %s1864_s17 }
 0x1af   : > { %s2496_s17 = smov %s1961_s28  ;;  %s2497_s18 = smov %s1872_s19 }
 0x1b0   : > { %s2498_s19 = smov %s2500_s23  ;;  %20 = sbr.rel (!%p18_p10) target bundleno = 6 (0x6), region = 103 }
 0x1b7   :  { %1361 = vsyncpa [#allocation4], 1 }
 0x1b8   :  { %1363 = vsyncpa [#allocation4 + $0x1], 1 }
 0x1b9   :  { %1364 = vsyncpa [#allocation6], 1 }
 0x1ba   :  { %1366 = vsyncpa [#allocation6 + $0x1], 1 }

</bundles_post_ra>
